<compile_context>
chip_gen: v6e
topology: v6e:2x2x1
jax: 0.10.0
libtpu: 0.0.40
codegen_flags: <defaults>
</compile_context>

<pallas_src>
import functools

import jax
import jax.numpy as jnp
from jax import lax
from jax.experimental import pallas as pl
from jax.experimental.pallas import tpu as pltpu


# ---------------------------------------------------------------------------
# Fused kernel: one program per batch element.
#   x:     [1, S, H]              (H = num_q_heads * head_dim)
#   wqkv:  [H, HQ*D + 2*HKV*D]    ([wq | wk | wv] concatenated on the out dim)
#   bv:    [1, HKV*D]             (only v_proj has a bias)
#   wo:    [HQ*D, H]
#   out:   [1, S, H]
# ---------------------------------------------------------------------------
def _gqa_fused_kernel(x_ref, wqkv_ref, bv_ref, wo_ref, o_ref, *,
                      num_q_heads, num_kv_heads, head_dim, scale):
    S = x_ref.shape[1]
    HQD = num_q_heads * head_dim
    KVD = num_kv_heads * head_dim
    num_groups = num_q_heads // num_kv_heads

    x = x_ref[0]                                                    # [S, H]

    # Fused QKV projection: one MXU pass, K=H, N=HQD+2*KVD (lane-dense).
    qkv = jnp.dot(x, wqkv_ref[...],
                  preferred_element_type=jnp.float32)               # [S, HQD+2*KVD]

    q = qkv[:, :HQD] * scale                                        # [S, HQ*D]
    k = qkv[:, HQD:HQD + KVD]                                       # [S, HKV*D]
    v = qkv[:, HQD + KVD:] + bv_ref[...]                            # [S, HKV*D]

    # Per-query-head attention (static, unrolled loop; HQ is small).
    # GQA sharing: query head h uses kv head h // num_groups (== repeat_interleave).
    head_outs = []
    for h in range(num_q_heads):
        kvh = h // num_groups
        qh = q[:, h * head_dim:(h + 1) * head_dim]                  # [S, D]
        kh = k[:, kvh * head_dim:(kvh + 1) * head_dim]              # [S, D]
        vh = v[:, kvh * head_dim:(kvh + 1) * head_dim]              # [S, D]

        # scores = qh @ kh^T without an explicit transpose: contract D on both.
        s = lax.dot_general(qh, kh, (((1,), (1,)), ((), ())),
                            preferred_element_type=jnp.float32)     # [S, S]
        s = s - jnp.max(s, axis=-1, keepdims=True)
        p = jnp.exp(s)
        p = p * pl.reciprocal(jnp.sum(p, axis=-1, keepdims=True), approx=False)
        head_outs.append(jnp.dot(p, vh,
                                 preferred_element_type=jnp.float32))  # [S, D]

    # Merge heads -> lane-dense [S, HQ*D] (== torch transpose(1,2).view).
    attn = jnp.concatenate(head_outs, axis=-1)                      # [S, HQ*D]

    # Output projection (out_proj has no bias); dropout is identity in eval.
    out = jnp.dot(attn, wo_ref[...],
                  preferred_element_type=jnp.float32)               # [S, H]
    o_ref[0] = out.astype(o_ref.dtype)


def gqa_forward(hidden_states, params, *, num_q_heads, num_kv_heads, head_dim):
    """hidden_states: [B, S, H] -> [B, S, H]."""
    B, S, H = hidden_states.shape
    HQD = num_q_heads * head_dim
    KVD = num_kv_heads * head_dim
    QKV_N = HQD + 2 * KVD
    scale = head_dim ** (-0.5)

    # Fuse the three projection weights once on the host side.
    wqkv = jnp.concatenate([params["wq"], params["wk"], params["wv"]], axis=1)  # [H, QKV_N]
    bv = params["bv"].reshape(1, KVD)
    wo = params["wo"]                                                            # [HQD, H]

    kernel = functools.partial(
        _gqa_fused_kernel,
        num_q_heads=num_q_heads, num_kv_heads=num_kv_heads,
        head_dim=head_dim, scale=scale)

    return pl.pallas_call(
        kernel,
        out_shape=jax.ShapeDtypeStruct((B, S, H), hidden_states.dtype),
        grid=(B,),
        in_specs=[
            pl.BlockSpec((1, S, H), lambda b: (b, 0, 0)),       # per-batch activations
            pl.BlockSpec((H, QKV_N), lambda b: (0, 0)),         # resident fused QKV weight
            pl.BlockSpec((1, KVD), lambda b: (0, 0)),           # resident v bias
            pl.BlockSpec((HQD, H), lambda b: (0, 0)),           # resident out weight
        ],
        out_specs=pl.BlockSpec((1, S, H), lambda b: (b, 0, 0)),
        compiler_params=pltpu.CompilerParams(
            dimension_semantics=("parallel",)),                 # v7x: split batch over 2 TCs
    )(hidden_states, wqkv, bv, wo)


# ---------------------------------------------------------------------------
# Pure-JAX reference (mirrors the PyTorch module's eval forward)
# ---------------------------------------------------------------------------
def gqa_reference(hidden_states, params, *, num_q_heads, num_kv_heads, head_dim):
    B, S, H = hidden_states.shape
    num_groups = num_q_heads // num_kv_heads
    scale = head_dim ** (-0.5)
    x = hidden_states.reshape(B * S, H)
    q = (x @ params["wq"] + params["bq"]).reshape(B, S, num_q_heads, head_dim).transpose(0, 2, 1, 3)
    k = (x @ params["wk"] + params["bk"]).reshape(B, S, num_kv_heads, head_dim).transpose(0, 2, 1, 3)
    v = (x @ params["wv"] + params["bv"]).reshape(B, S, num_kv_heads, head_dim).transpose(0, 2, 1, 3)
    k = jnp.repeat(k, num_groups, axis=1)
    v = jnp.repeat(v, num_groups, axis=1)
    s = jnp.einsum("bhqd,bhkd->bhqk", q * scale, k)
    p = jax.nn.softmax(s, axis=-1)
    o = jnp.einsum("bhqk,bhkd->bhqd", p, v)
    o = o.transpose(0, 2, 1, 3).reshape(B * S, num_q_heads * head_dim)
    return (o @ params["wo"] + params["bo"]).reshape(B, S, H)


if __name__ == "__main__":
    # Small GQA config: 4 query heads, 2 kv heads, head_dim 32 -> hidden = 128.
    num_q_heads, num_kv_heads, head_dim = 4, 2, 32
    hidden = num_q_heads * head_dim
    B, S = 2, 16

    key = jax.random.PRNGKey(0)
    keys = jax.random.split(key, 7)
    std = 0.02
    params = {
        # weights stored [in, out] (transpose of PyTorch nn.Linear weight layout)
        "wq": std * jax.random.normal(keys[0], (hidden, num_q_heads * head_dim), jnp.float32),
        "bq": jnp.zeros((num_q_heads * head_dim,), jnp.float32),   # use_bias=False
        "wk": std * jax.random.normal(keys[1], (hidden, num_kv_heads * head_dim), jnp.float32),
        "bk": jnp.zeros((num_kv_heads * head_dim,), jnp.float32),  # use_bias=False
        "wv": std * jax.random.normal(keys[2], (hidden, num_kv_heads * head_dim), jnp.float32),
        "bv": 0.01 * jax.random.normal(keys[3], (num_kv_heads * head_dim,), jnp.float32),  # v_proj bias
        "wo": std * jax.random.normal(keys[4], (num_q_heads * head_dim, hidden), jnp.float32),
        "bo": jnp.zeros((hidden,), jnp.float32),                   # use_bias=False
    }

    hidden_states = jax.random.normal(keys[5], (B, S, hidden), jnp.float32)

    out = gqa_forward(hidden_states, params,
                      num_q_heads=num_q_heads, num_kv_heads=num_kv_heads,
                      head_dim=head_dim)
    out = jax.block_until_ready(out)

    ref = gqa_reference(hidden_states, params,
                        num_q_heads=num_q_heads, num_kv_heads=num_kv_heads,
                        head_dim=head_dim)
    assert out.shape == (B, S, hidden)
    assert jnp.allclose(out, ref, atol=1e-4, rtol=1e-4), "mismatch vs reference"

    print("KERNEL_OK")
</pallas_src>

<mosaic_0001>
module attributes {stable_mosaic.version = 11 : i64} {
  func.func @_gqa_fused_kernel(%arg0: i32, %arg1: memref<1x16x128xf32, #tpu.memory_space<vmem>>, %arg2: memref<128x256xf32, #tpu.memory_space<vmem>>, %arg3: memref<1x64xf32, #tpu.memory_space<vmem>>, %arg4: memref<128x128xf32, #tpu.memory_space<vmem>>, %arg5: memref<1x16x128xf32, #tpu.memory_space<vmem>>) attributes {dimension_semantics = [#tpu.dimension_semantics<parallel>], iteration_bounds = array<i64: 2>, scalar_prefetch = 0 : i64, scratch_operands = 0 : i64, tpu.core_type = #tpu.core_type<tc>, window_params = [{transform_indices = @transform_0, window_bounds = array<i64: 1, 16, 128>}, {pipeline_mode = #tpu.pipeline_mode<synchronous>, transform_indices = @transform_1, window_bounds = array<i64: 128, 256>}, {pipeline_mode = #tpu.pipeline_mode<synchronous>, transform_indices = @transform_2, window_bounds = array<i64: 1, 64>}, {pipeline_mode = #tpu.pipeline_mode<synchronous>, transform_indices = @transform_3, window_bounds = array<i64: 128, 128>}, {transform_indices = @transform_4, window_bounds = array<i64: 1, 16, 128>}]} {
    %c0 = arith.constant 0 : index
    %c0_0 = arith.constant 0 : index
    %c0_1 = arith.constant 0 : index
    %0 = vector.load %arg1[%c0, %c0_0, %c0_1] : memref<1x16x128xf32, #tpu.memory_space<vmem>>, vector<1x16x128xf32>
    %1 = vector.shape_cast %0 : vector<1x16x128xf32> to vector<16x128xf32>
    %c0_2 = arith.constant 0 : index
    %c0_3 = arith.constant 0 : index
    %2 = vector.load %arg2[%c0_2, %c0_3] : memref<128x256xf32, #tpu.memory_space<vmem>>, vector<128x256xf32>
    %cst = arith.constant dense<0.000000e+00> : vector<16x256xf32>
    %3 = tpu.matmul %1, %2, %cst {dimension_numbers = #tpu.dot_dimension_numbers<[1], [0], [0], [1], [0, 0, 1, 1], [], []>} : vector<16x128xf32>, vector<128x256xf32>, vector<16x256xf32> -> vector<16x256xf32>
    %4 = vector.extract_strided_slice %3 {offsets = [0, 0], sizes = [16, 128], strides = [1, 1]} : vector<16x256xf32> to vector<16x128xf32>
    %cst_4 = arith.constant 0.176776692 : f32
    %5 = vector.broadcast %cst_4 : f32 to vector<16x128xf32>
    %6 = arith.mulf %4, %5 : vector<16x128xf32>
    %7 = vector.extract_strided_slice %3 {offsets = [0, 128], sizes = [16, 64], strides = [1, 1]} : vector<16x256xf32> to vector<16x64xf32>
    %8 = vector.extract_strided_slice %3 {offsets = [0, 192], sizes = [16, 64], strides = [1, 1]} : vector<16x256xf32> to vector<16x64xf32>
    %c0_5 = arith.constant 0 : index
    %c0_6 = arith.constant 0 : index
    %9 = vector.load %arg3[%c0_5, %c0_6] : memref<1x64xf32, #tpu.memory_space<vmem>>, vector<1x64xf32>
    %10 = vector.broadcast %9 : vector<1x64xf32> to vector<16x64xf32>
    %11 = arith.addf %8, %10 : vector<16x64xf32>
    %12 = vector.extract_strided_slice %6 {offsets = [0, 0], sizes = [16, 32], strides = [1, 1]} : vector<16x128xf32> to vector<16x32xf32>
    %13 = vector.extract_strided_slice %7 {offsets = [0, 0], sizes = [16, 32], strides = [1, 1]} : vector<16x64xf32> to vector<16x32xf32>
    %14 = vector.extract_strided_slice %11 {offsets = [0, 0], sizes = [16, 32], strides = [1, 1]} : vector<16x64xf32> to vector<16x32xf32>
    %cst_7 = arith.constant dense<0.000000e+00> : vector<16x16xf32>
    %15 = tpu.matmul %12, %13, %cst_7 {dimension_numbers = #tpu.dot_dimension_numbers<[1], [1], [0], [0], [0, 0, 1, 0], [], []>} : vector<16x32xf32>, vector<16x32xf32>, vector<16x16xf32> -> vector<16x16xf32>
    %cst_8 = arith.constant dense<0xFF800000> : vector<16xf32>
    %16 = vector.multi_reduction <maximumf>, %15, %cst_8 [1] : vector<16x16xf32> to vector<16xf32>
    %17 = vector.shape_cast %16 : vector<16xf32> to vector<16x1xf32>
    %18 = vector.broadcast %17 : vector<16x1xf32> to vector<16x16xf32>
    %19 = arith.subf %15, %18 : vector<16x16xf32>
    %20 = math.exp %19 : vector<16x16xf32>
    %cst_9 = arith.constant dense<0.000000e+00> : vector<16xf32>
    %21 = vector.multi_reduction <add>, %20, %cst_9 [1] : vector<16x16xf32> to vector<16xf32>
    %22 = vector.shape_cast %21 : vector<16xf32> to vector<16x1xf32>
    %23 = tpu.reciprocal %22 : vector<16x1xf32> -> vector<16x1xf32>
    %24 = vector.broadcast %23 : vector<16x1xf32> to vector<16x16xf32>
    %25 = arith.mulf %20, %24 : vector<16x16xf32>
    %cst_10 = arith.constant dense<0.000000e+00> : vector<16x32xf32>
    %26 = tpu.matmul %25, %14, %cst_10 {dimension_numbers = #tpu.dot_dimension_numbers<[1], [0], [0], [1], [0, 0, 1, 1], [], []>} : vector<16x16xf32>, vector<16x32xf32>, vector<16x32xf32> -> vector<16x32xf32>
    %27 = vector.extract_strided_slice %6 {offsets = [0, 32], sizes = [16, 32], strides = [1, 1]} : vector<16x128xf32> to vector<16x32xf32>
    %28 = vector.extract_strided_slice %7 {offsets = [0, 0], sizes = [16, 32], strides = [1, 1]} : vector<16x64xf32> to vector<16x32xf32>
    %29 = vector.extract_strided_slice %11 {offsets = [0, 0], sizes = [16, 32], strides = [1, 1]} : vector<16x64xf32> to vector<16x32xf32>
    %cst_11 = arith.constant dense<0.000000e+00> : vector<16x16xf32>
    %30 = tpu.matmul %27, %28, %cst_11 {dimension_numbers = #tpu.dot_dimension_numbers<[1], [1], [0], [0], [0, 0, 1, 0], [], []>} : vector<16x32xf32>, vector<16x32xf32>, vector<16x16xf32> -> vector<16x16xf32>
    %cst_12 = arith.constant dense<0xFF800000> : vector<16xf32>
    %31 = vector.multi_reduction <maximumf>, %30, %cst_12 [1] : vector<16x16xf32> to vector<16xf32>
    %32 = vector.shape_cast %31 : vector<16xf32> to vector<16x1xf32>
    %33 = vector.broadcast %32 : vector<16x1xf32> to vector<16x16xf32>
    %34 = arith.subf %30, %33 : vector<16x16xf32>
    %35 = math.exp %34 : vector<16x16xf32>
    %cst_13 = arith.constant dense<0.000000e+00> : vector<16xf32>
    %36 = vector.multi_reduction <add>, %35, %cst_13 [1] : vector<16x16xf32> to vector<16xf32>
    %37 = vector.shape_cast %36 : vector<16xf32> to vector<16x1xf32>
    %38 = tpu.reciprocal %37 : vector<16x1xf32> -> vector<16x1xf32>
    %39 = vector.broadcast %38 : vector<16x1xf32> to vector<16x16xf32>
    %40 = arith.mulf %35, %39 : vector<16x16xf32>
    %cst_14 = arith.constant dense<0.000000e+00> : vector<16x32xf32>
    %41 = tpu.matmul %40, %29, %cst_14 {dimension_numbers = #tpu.dot_dimension_numbers<[1], [0], [0], [1], [0, 0, 1, 1], [], []>} : vector<16x16xf32>, vector<16x32xf32>, vector<16x32xf32> -> vector<16x32xf32>
    %42 = vector.extract_strided_slice %6 {offsets = [0, 64], sizes = [16, 32], strides = [1, 1]} : vector<16x128xf32> to vector<16x32xf32>
    %43 = vector.extract_strided_slice %7 {offsets = [0, 32], sizes = [16, 32], strides = [1, 1]} : vector<16x64xf32> to vector<16x32xf32>
    %44 = vector.extract_strided_slice %11 {offsets = [0, 32], sizes = [16, 32], strides = [1, 1]} : vector<16x64xf32> to vector<16x32xf32>
    %cst_15 = arith.constant dense<0.000000e+00> : vector<16x16xf32>
    %45 = tpu.matmul %42, %43, %cst_15 {dimension_numbers = #tpu.dot_dimension_numbers<[1], [1], [0], [0], [0, 0, 1, 0], [], []>} : vector<16x32xf32>, vector<16x32xf32>, vector<16x16xf32> -> vector<16x16xf32>
    %cst_16 = arith.constant dense<0xFF800000> : vector<16xf32>
    %46 = vector.multi_reduction <maximumf>, %45, %cst_16 [1] : vector<16x16xf32> to vector<16xf32>
    %47 = vector.shape_cast %46 : vector<16xf32> to vector<16x1xf32>
    %48 = vector.broadcast %47 : vector<16x1xf32> to vector<16x16xf32>
    %49 = arith.subf %45, %48 : vector<16x16xf32>
    %50 = math.exp %49 : vector<16x16xf32>
    %cst_17 = arith.constant dense<0.000000e+00> : vector<16xf32>
    %51 = vector.multi_reduction <add>, %50, %cst_17 [1] : vector<16x16xf32> to vector<16xf32>
    %52 = vector.shape_cast %51 : vector<16xf32> to vector<16x1xf32>
    %53 = tpu.reciprocal %52 : vector<16x1xf32> -> vector<16x1xf32>
    %54 = vector.broadcast %53 : vector<16x1xf32> to vector<16x16xf32>
    %55 = arith.mulf %50, %54 : vector<16x16xf32>
    %cst_18 = arith.constant dense<0.000000e+00> : vector<16x32xf32>
    %56 = tpu.matmul %55, %44, %cst_18 {dimension_numbers = #tpu.dot_dimension_numbers<[1], [0], [0], [1], [0, 0, 1, 1], [], []>} : vector<16x16xf32>, vector<16x32xf32>, vector<16x32xf32> -> vector<16x32xf32>
    %57 = vector.extract_strided_slice %6 {offsets = [0, 96], sizes = [16, 32], strides = [1, 1]} : vector<16x128xf32> to vector<16x32xf32>
    %58 = vector.extract_strided_slice %7 {offsets = [0, 32], sizes = [16, 32], strides = [1, 1]} : vector<16x64xf32> to vector<16x32xf32>
    %59 = vector.extract_strided_slice %11 {offsets = [0, 32], sizes = [16, 32], strides = [1, 1]} : vector<16x64xf32> to vector<16x32xf32>
    %cst_19 = arith.constant dense<0.000000e+00> : vector<16x16xf32>
    %60 = tpu.matmul %57, %58, %cst_19 {dimension_numbers = #tpu.dot_dimension_numbers<[1], [1], [0], [0], [0, 0, 1, 0], [], []>} : vector<16x32xf32>, vector<16x32xf32>, vector<16x16xf32> -> vector<16x16xf32>
    %cst_20 = arith.constant dense<0xFF800000> : vector<16xf32>
    %61 = vector.multi_reduction <maximumf>, %60, %cst_20 [1] : vector<16x16xf32> to vector<16xf32>
    %62 = vector.shape_cast %61 : vector<16xf32> to vector<16x1xf32>
    %63 = vector.broadcast %62 : vector<16x1xf32> to vector<16x16xf32>
    %64 = arith.subf %60, %63 : vector<16x16xf32>
    %65 = math.exp %64 : vector<16x16xf32>
    %cst_21 = arith.constant dense<0.000000e+00> : vector<16xf32>
    %66 = vector.multi_reduction <add>, %65, %cst_21 [1] : vector<16x16xf32> to vector<16xf32>
    %67 = vector.shape_cast %66 : vector<16xf32> to vector<16x1xf32>
    %68 = tpu.reciprocal %67 : vector<16x1xf32> -> vector<16x1xf32>
    %69 = vector.broadcast %68 : vector<16x1xf32> to vector<16x16xf32>
    %70 = arith.mulf %65, %69 : vector<16x16xf32>
    %cst_22 = arith.constant dense<0.000000e+00> : vector<16x32xf32>
    %71 = tpu.matmul %70, %59, %cst_22 {dimension_numbers = #tpu.dot_dimension_numbers<[1], [0], [0], [1], [0, 0, 1, 1], [], []>} : vector<16x16xf32>, vector<16x32xf32>, vector<16x32xf32> -> vector<16x32xf32>
    %72 = tpu.concatenate %26, %41, %56, %71 in 1 : vector<16x32xf32>, vector<16x32xf32>, vector<16x32xf32>, vector<16x32xf32> -> vector<16x128xf32>
    %c0_23 = arith.constant 0 : index
    %c0_24 = arith.constant 0 : index
    %73 = vector.load %arg4[%c0_23, %c0_24] : memref<128x128xf32, #tpu.memory_space<vmem>>, vector<128x128xf32>
    %cst_25 = arith.constant dense<0.000000e+00> : vector<16x128xf32>
    %74 = tpu.matmul %72, %73, %cst_25 {dimension_numbers = #tpu.dot_dimension_numbers<[1], [0], [0], [1], [0, 0, 1, 1], [], []>} : vector<16x128xf32>, vector<128x128xf32>, vector<16x128xf32> -> vector<16x128xf32>
    %c0_26 = arith.constant 0 : index
    %c0_27 = arith.constant 0 : index
    %c0_28 = arith.constant 0 : index
    %75 = vector.load %arg5[%c0_26, %c0_27, %c0_28] : memref<1x16x128xf32, #tpu.memory_space<vmem>>, vector<1x16x128xf32>
    %76 = vector.shape_cast %75 : vector<1x16x128xf32> to vector<16x128xf32>
    %77 = vector.shape_cast %74 : vector<16x128xf32> to vector<1x16x128xf32>
    tpu.vector_store %arg5[%c0_26, %c0_27, %c0_28], %77 {strides = array<i32>} : memref<1x16x128xf32, #tpu.memory_space<vmem>>, vector<1x16x128xf32>,
    return
  }
  func.func @transform_0(%arg0: i32) -> (i32, i32, i32) {
    %c0_i32 = arith.constant 0 : i32
    %c0_i32_0 = arith.constant 0 : i32
    %c0_i32_1 = arith.constant 0 : i32
    return %arg0, %c0_i32, %c0_i32_0 : i32, i32, i32
  }
  func.func @transform_1(%arg0: i32) -> (i32, i32) {
    %c0_i32 = arith.constant 0 : i32
    %c0_i32_0 = arith.constant 0 : i32
    %c0_i32_1 = arith.constant 0 : i32
    return %c0_i32, %c0_i32_0 : i32, i32
  }
  func.func @transform_2(%arg0: i32) -> (i32, i32) {
    %c0_i32 = arith.constant 0 : i32
    %c0_i32_0 = arith.constant 0 : i32
    %c0_i32_1 = arith.constant 0 : i32
    return %c0_i32, %c0_i32_0 : i32, i32
  }
  func.func @transform_3(%arg0: i32) -> (i32, i32) {
    %c0_i32 = arith.constant 0 : i32
    %c0_i32_0 = arith.constant 0 : i32
    %c0_i32_1 = arith.constant 0 : i32
    return %c0_i32, %c0_i32_0 : i32, i32
  }
  func.func @transform_4(%arg0: i32) -> (i32, i32, i32) {
    %c0_i32 = arith.constant 0 : i32
    %c0_i32_0 = arith.constant 0 : i32
    %c0_i32_1 = arith.constant 0 : i32
    return %arg0, %c0_i32, %c0_i32_0 : i32, i32, i32
  }
}

</mosaic_0001>

<bundles_post_ra>
// kernel: tpu_custom_call.1
= control target key start
LH: loop header
LB: loop body
LE: loop exit
PB: predicated region body
PF: predicated region fallthrough
CT: control target
= control target key end

     0   :  { %9 = vsyncpa [#allocation3], 0  ;;  %s2192_s0 = inlined_call_operand.hbm [shape: f32[2,16,128], index: 0, kind: input, shape index: {}]   ;;  %s2193_s1 = inlined_call_operand.hbm [shape: f32[128,256], index: 1, kind: input, shape index: {}]   ;;  %s2194_s2 = inlined_call_operand.vmem [shape: f32[1,64], index: 2, kind: input, shape index: {}]   ;;  %s2195_s3 = inlined_call_operand.hbm [shape: f32[128,128], index: 3, kind: input, shape index: {}]   ;;  %s2196_s4 = inlined_call_operand.hbm [shape: f32[2,16,128], index: 4, kind: output, shape index: {}]  }
   0x1   :  { %11 = vsyncpa [#allocation3 + $0x1], 0 }
   0x2   :  { %12 = vsyncpa [#allocation6], 0 }
   0x3   :  { %13 = vsyncpa [#allocation4], 0 }
   0x4   :  { %15 = vsyncpa [#allocation4 + $0x1], 0  ;;  %s1871_s15 = smov 0   ;;  %s1873_s16 = smov 0  }
   0x5   :  { %s1875_s17 = smov 0   ;;  %s1877_s18 = smov 0  }
   0x6 LB: > { %s1892_s19 = sadd.s32 4294967295, %s1830_s18   ;;  %s1372_s20 = sadd.s32 4294967294, %s1830_s18   ;;  %s1830_s18 = sphi %s1877_s18, %s2218_s18   ;;  %s1826_s17 = sphi %s1875_s17, %s2217_s17   ;;  %s1822_s16 = sphi %s1873_s16, %s2216_s16   ;;  %s1818_s15 = sphi %s1871_s15, %s2215_s15  }
   0x7   : > { %p41_p0 = scmp.ne.s32.totalorder %s1822_s16, %s1818_s15  ;;  %p2197_p1 = scmp.eq.s32.totalorder %s1892_s19, 0 }
   0x8   : > { %p134_p3 = scmp.eq.s32.totalorder %s1372_s20, 1  ;;  %p1373_p5 = scmp.ge.s32.totalorder %s1830_s18, 1 }
   0x9   : > { %p1901_p4 = por %p2197_p1, %p41_p0  ;;  %p141_p7 = scmp.lt.s32.totalorder %s1830_s18, 3 }
   0xa   : > { %p1906_p6 = por %p134_p3, %p41_p0  ;;  %s1832_s24 = smov [#allocation5]  }
   0xb   : > { %s2201_s21 = scalar_select %p1901_p4, 1, 0 }
   0xc   : > { %s2202_s22 = scalar_select %p1906_p6, 1, 0 }
   0xd   : > { %p1911_p8 = pnand %p1373_p5, %p141_p7  ;;  %s153_s25 = sshll.u32 %s1832_s24, 4  ;;  %s154_s25 = int_to_ptr.vmem [resolvable:$true] %s153_s25 }
   0xe   : > { %s1833_s27 = smov [#allocation7]   ;;  %s1693_s29 = scalar_lea.vmem %s154_s25, 4096 }
   0xf   : > { %s2203_s23 = scalar_select %p1911_p8, 1, 0 }
  0x10   : > { %p1570_p9 = pneg %p1911_p8  ;;  %s169_s28 = sshll.u32 %s1833_s27, 4  ;;  %s170_s28 = int_to_ptr.vmem [resolvable:$true] %s169_s28 }
  0x11   : > { %p1694_p13 = scmp.ne.s32.totalorder %s154_s25, %s1693_s29  ;;  %p1701_p5 = scmp.lt.s32.totalorder %s154_s25, %s154_s25 }
  0x12   : > { %p1920_p11 = pnand %p1570_p9, %p2197_p1  ;;  %p1702_p7 = scmp.lt.s32.totalorder %s1693_s29, %s1693_s29 }
  0x14   : > { %p1684_p12 = pneg %p1920_p11  ;;  %p1703_p10 = por %p1702_p7, %p1701_p5 }
  0x16   : > { %p1696_p0 = pnand %p1694_p13, %p1684_p12 }
  0x18   : > { %p1697_p3 = pneg %p1696_p0 }
  0x1a   : > { %p1704_p9 = pnand %p1703_p10, %p1697_p3 }
  0x1c   : > { %1707 = shalt.err (!%p1704_p9)
}
  0x1d   : > { %s1834_s30 = smov 256   ;;  %s1835_s5 = smov 16  }
  0x1e   : > { %1573 = dma.hbm_to_vmem [thread:$0]  (!%p1920_p11), %s2193_s1, 4096, %s154_s25, [#allocation6], %s1834_s30, %s1834_s30, %s1835_s5  }
  0x1f   : > { %s1719_s8 = scalar_lea.vmem %s170_s28, 2048  ;;  %p1727_p2 = scmp.lt.s32.totalorder %s170_s28, %s170_s28 }
  0x20   : > { %p1720_p1 = scmp.ne.s32.totalorder %s170_s28, %s1719_s8  ;;  %p1728_p6 = scmp.lt.s32.totalorder %s1719_s8, %s1719_s8 }
  0x22   : > { %p1722_p13 = pnand %p1720_p1, %p1684_p12  ;;  %p1729_p5 = por %p1728_p6, %p1727_p2 }
  0x24   : > { %p1723_p0 = pneg %p1722_p13 }
  0x26   : > { %p1730_p10 = pnand %p1729_p5, %p1723_p0 }
  0x28   : > { %1733 = shalt.err (!%p1730_p10)
}
  0x29   : > { %s1836_s9 = smov 128   ;;  %s1837_s10 = smov 8  }
  0x2a   : > { %1576 = dma.hbm_to_vmem [thread:$0]  (!%p1920_p11), %s2195_s3, 2048, %s170_s28, [#allocation6], %s1836_s9, %s1836_s9, %s1837_s10  }
  0x2b   : > { %s1946_s13 = sadd.s32 1, %s1830_s18   ;;  %s28_s20 = sadd.s32 1, %s1826_s17 }
  0x2c   : > { %s25_s14 = ssub.s32 %s1830_s18, %s1946_s13  ;;  %p35_p2 = scmp.ne.s32.totalorder %s1826_s17, %s1822_s16 }
  0x2d   : > { %p26_p1 = scmp.eq.s32.totalorder %s25_s14, 0  ;;  %p36_p6 = scmp.eq.s32.totalorder %s1830_s18, 0 }
  0x2e   : > { %p2205_p3 = scmp.eq.s32.totalorder %s1892_s19, 1  ;;  %p1587_p9 = scmp.lt.s32.totalorder %s1830_s18, 2 }
  0x2f   : > { %s1955_s24 = scalar_select %p26_p1, %s1826_s17, %s28_s20  }
  0x30   : > { %p37_p12 = por %p36_p6, %p35_p2  ;;  %p1959_p7 = por %p2205_p3, %p35_p2 }
  0x31   : > { %s183_s26 = sand.u32 1, %s1826_s17   ;;  %s1415_s28 = sshll.u32 %s1830_s18, 8 }
  0x32   : > { %s2206_s25 = scalar_select %p1959_p7, 1, 0 }
  0x33   : > { %s1377_s27 = sshll.u32 %s183_s26, 4  ;;  %s1969_s5 = scalar_lea.hbm %s2192_s0, %s1415_s28 }
  0x34   : > { %s187_s6 = scalar_lea.vmem [#allocation2], %s1377_s27  ;;  %p1973_p11 = pnand %p1587_p9, %p37_p12 }
  0x35   : > { %s194_s7 = sshll.u32 %s187_s6, 4  ;;  %s1977_s11 = scalar_lea.sflag [#allocation3], %s183_s26  ;;  %s1971_s7 = int_to_ptr.vmem [resolvable:$true] %s194_s7 }
  0x36   : > { %s1734_s12 = scalar_lea.hbm %s1969_s5, 256  ;;  %p1736_p0 = pneg %p1973_p11 }
  0x37   : > { %p1735_p13 = scmp.ne.s32.totalorder %s1969_s5, %s1734_s12  ;;  %s1739_s27 = scalar_lea.hbm %s2192_s0, 512 }
  0x38   : > { %p1740_p1 = scmp.lt.s32.totalorder %s1969_s5, %s2192_s0  ;;  %p1741_p2 = scmp.lt.s32.totalorder %s1739_s27, %s1734_s12 }
  0x39   : > { %p1737_p5 = pnand %p1736_p0, %p1735_p13 }
  0x3a   : > { %p1742_p6 = por %p1741_p2, %p1740_p1 }
  0x3b   : > { %p1738_p10 = pneg %p1737_p5 }
  0x3d   : > { %p1743_p12 = pnand %p1742_p6, %p1738_p10 }
  0x3f   : > { %1746 = shalt.err (!%p1743_p12)
}
  0x40   : > { %s1747_s26 = scalar_lea.vmem %s1971_s7, 256  ;;  %s1838_s30 = smov [#allocation2]  }
  0x41   : > { %p1748_p3 = scmp.ne.s32.totalorder %s1971_s7, %s1747_s26  ;;  %s1752_s6 = sshll.u32 %s1838_s30, 4  ;;  %s1753_s6 = int_to_ptr.vmem [resolvable:$false] %s1752_s6 }
  0x42   : > { %s1754_s14 = scalar_lea.vmem %s1753_s6, 512  ;;  %p1755_p5 = scmp.lt.s32.totalorder %s1971_s7, %s1753_s6 }
  0x43   : > { %p1750_p9 = pnand %p1748_p3, %p1736_p0  ;;  %p1756_p7 = scmp.lt.s32.totalorder %s1754_s14, %s1747_s26 }
  0x45   : > { %p1751_p13 = pneg %p1750_p9  ;;  %p1757_p4 = por %p1756_p7, %p1755_p5 }
  0x47   : > { %p1758_p8 = pnand %p1757_p4, %p1751_p13 }
  0x49   : > { %1761 = shalt.err (!%p1758_p8)
}
  0x4a   : > { %1580 = dma.hbm_to_vmem [thread:$0]  (!%p1973_p11), %s1969_s5, 256, %s1971_s7, %s1977_s11, %s1836_s9, %s1836_s9, %s1837_s10  }
  0x4b   : > { %p2208_p0 = scmp.ne.s32.totalorder %s2203_s23, 0 }
  0x4c   : > { %s2004_s12 = sand.u32 (!%p2208_p0), 1, %s1822_s16   ;;  %p2209_p4 = scmp.ne.s32.totalorder (!%p2208_p0), %s2201_s21, 0 }
  0x4d   : > { %206 = sbr.rel (%p2208_p0) target bundleno = 2917 (0xb65), region = 36  ;;  %s1381_s20 = sshll.u32 (!%p2208_p0), %s2004_s12, 4 }
  0x4e   : > { %s209_s27 = scalar_lea.sflag (!%p2208_p0), [#allocation3], %s2004_s12  ;;  %s2010_s8 = scalar_lea.vmem (!%p2208_p0), [#allocation2], %s1381_s20 }
  0x52   : > { %1805 = dma.done.wait (%p2209_p4), %s209_s27, 256  }
  0x53   : > { %1807 = vsyncadd (%p2209_p4), %s209_s27, 4294967040  ;;  %p2210_p8 = scmp.eq.s32.totalorder %s1892_s19, 0 }
  0x55   : > { %1809 = dma.done.wait (%p2210_p8), [#allocation6], 6144   ;;  %p2211_p7 = pmov %p2210_p8 }
  0x56   : > { %v1839_v0 = vmov 0.0   ;;  %v278_v1 = vld [vmem:[#allocation5 + $0xf8] sm:$0xff]  ;;  %v277_v2 = vld [vmem:[#allocation5 + $0xf0] sm:$0xff]  ;;  %v276_v3 = vld [vmem:[#allocation5 + $0xe8] sm:$0xff]  ;;  %s1840_s9 = smov 64   ;;  %vm369_vm0 = vcmask 261120  }
  0x57   : > { %1811 = vsyncadd (%p2211_p7), [#allocation6], 4294961152  ;;  %343 = vmatprep.mubr.f32.mxu0 %v1839_v0  ;;  %279 = vmatprep.subr.mxu0 %v278_v1  ;;  %v275_v4 = vld [vmem:[#allocation5 + $0xe0] sm:$0xff]  ;;  %v274_v5 = vld [vmem:[#allocation5 + $0xd8] sm:$0xff]  ;;  %vm457_vm1 = vcmask 130048   ;;  %s1841_s10 = smov 96  }
  0x58   : > { %280 = vmatpush1.msra.mxu0 %v277_v2  ;;  %v273_v6 = vld [vmem:[#allocation5 + $0xd0] sm:$0xff]  ;;  %v272_v7 = vld [vmem:[#allocation5 + $0xc8] sm:$0xff]  ;;  %v271_v8 = vld [vmem:[#allocation5 + $0xc0] sm:$0xff]  ;;  %s1842_s5 = smov 32   ;;  %vm1167_vm2 = vcmask 523264   ;;  %vm1170_vm3 = vcmask 785408  }
  0x59   : > { %281 = vmatprep.subr.mxu0 %v276_v3  ;;  %v270_v9 = vld [vmem:[#allocation5 + $0xb8] sm:$0xff]  ;;  %v269_v10 = vld [vmem:[#allocation5 + $0xb0] sm:$0xff]  ;;  %v268_v11 = vld [vmem:[#allocation5 + $0xa8] sm:$0xff]  ;;  %s244_s7 = scalar_lea.vmem [#allocation8], %s1381_s20  ;;  %s1416_s28 = sshll.u32 %s1892_s19, 8 }
  0x5a   : > { %282 = vmatpush1.msra.mxu0 %v275_v4  ;;  %v267_v12 = vld [vmem:[#allocation5 + $0xa0] sm:$0xff]  ;;  %v266_v13 = vld [vmem:[#allocation5 + $0x98] sm:$0xff]  ;;  %v265_v14 = vld [vmem:[#allocation5 + $0x90] sm:$0xff]  ;;  %s1280_s11 = sshll.u32 %s244_s7, 4  ;;  %s2149_s30 = scalar_lea.hbm %s2196_s4, %s1416_s28  ;;  %s2144_s11 = int_to_ptr.vmem [resolvable:$true] %s1280_s11 }
  0x5b   : > { %283 = vmatprep.subr.mxu0 %v274_v5  ;;  %v1385_v15 = vld [vmem:[%s2194_s2] ss:$0 sm:$0xff]  ;;  %v264_v16 = vld [vmem:[#allocation5 + $0x88] sm:$0xff]  ;;  %v262_v18 = vld [vmem:[#allocation5 + $0x78] sm:$0xff]  ;;  %s1267_s6 = scalar_lea.sflag [#allocation4], %s2004_s12  ;;  %s1762_s14 = scalar_lea.vmem %s2144_s11, 256 }
  0x5c   : > { %284 = vmatpush1.msra.mxu0 %v273_v6  ;;  %364 = vrot.lane.b32.xlu1 %v1385_v15, %s1840_s9  ;;  %v263_v17 = vld [vmem:[#allocation5 + $0x80] sm:$0xff]  ;;  %v261_v19 = vld [vmem:[#allocation5 + $0x70] sm:$0xff]  ;;  %v260_v20 = vld [vmem:[#allocation5 + $0x68] sm:$0xff]  ;;  %p1763_p11 = scmp.ne.s32.totalorder %s2144_s11, %s1762_s14  ;;  %p2212_p10 = scmp.ne.s32.totalorder %s2206_s25, 0 }
  0x5d   : > { %285 = vmatprep.subr.mxu0 %v272_v7  ;;  %v259_v21 = vld [vmem:[#allocation5 + $0x60] sm:$0xff]  ;;  %v258_v22 = vld [vmem:[#allocation5 + $0x58] sm:$0xff]  ;;  %v257_v23 = vld [vmem:[#allocation5 + $0x50] sm:$0xff]  ;;  %s1843_s19 = smov [#allocation8]  }
  0x5e   : > { %286 = vmatpush1.msra.mxu0 %v271_v8  ;;  %v256_v24 = vld [vmem:[#allocation5 + $0x48] sm:$0xff]  ;;  %v255_v25 = vld [vmem:[#allocation5 + $0x40] sm:$0xff]  ;;  %v254_v26 = vld [vmem:[#allocation5 + $0x38] sm:$0xff]  ;;  %p1764_p1 = pnand %p1763_p11, %p2212_p10  ;;  %s1766_s20 = sshll.u32 %s1843_s19, 4  ;;  %s1767_s20 = int_to_ptr.vmem [resolvable:$false] %s1766_s20 }
  0x5f   : > { %287 = vmatprep.subr.mxu0 %v270_v9  ;;  %v253_v27 = vld [vmem:[#allocation5 + $0x30] sm:$0xff]  ;;  %v252_v28 = vld [vmem:[#allocation5 + $0x28] sm:$0xff]  ;;  %v251_v29 = vld [vmem:[#allocation5 + $0x20] sm:$0xff]  ;;  %s1768_s27 = scalar_lea.vmem %s1767_s20, 512  ;;  %p1769_p6 = scmp.lt.s32.totalorder %s2144_s11, %s1767_s20 }
  0x60   : > { %288 = vmatpush1.msra.mxu0 %v269_v10  ;;  %v250_v30 = vld [vmem:[#allocation5 + $0x18] sm:$0xff]  ;;  %v249_v31 = vld [vmem:[#allocation5 + $0x10] sm:$0xff]  ;;  %v248_v32 = vld [vmem:[#allocation5 + $0x8] sm:$0xff]  ;;  %p1765_p2 = pneg %p1764_p1  ;;  %p1770_p12 = scmp.lt.s32.totalorder %s1768_s27, %s1762_s14 }
  0x61   : > { %289 = vmatprep.subr.mxu0 %v268_v11  ;;  %v247_v33 = vld [vmem:[#allocation5] sm:$0xff]  ;;  %v246_v35 = vld [vmem:[%s2010_s8 + $0x8] sm:$0xff] }
  0x62   : > { %290 = vmatpush1.msra.mxu0 %v267_v12  ;;  %v245_v34 = vld [vmem:[%s2010_s8] sm:$0xff]  ;;  %p1771_p3 = por %p1770_p12, %p1769_p6 }
  0x63   : > { %291 = vmatprep.subr.mxu0 %v266_v13 }
  0x64   : > { %292 = vmatpush1.msra.mxu0 %v265_v14  ;;  %p1772_p9 = pnand %p1771_p3, %p1765_p2 }
  0x65   : > { %293 = vmatprep.subr.mxu0 %v264_v16 }
  0x66   : > { %294 = vmatpush1.msra.mxu0 %v263_v17 }
  0x67   : > { %295 = vmatprep.subr.mxu0 %v262_v18 }
  0x68   : > { %296 = vmatpush1.msra.mxu0 %v261_v19 }
  0x69   : > { %297 = vmatprep.subr.mxu0 %v260_v20 }
  0x6a   : > { %298 = vmatpush1.msra.mxu0 %v259_v21 }
  0x6b   : > { %299 = vmatprep.subr.mxu0 %v258_v22 }
  0x6c   : > { %300 = vmatpush1.msra.mxu0 %v257_v23 }
  0x6d   : > { %301 = vmatprep.subr.mxu0 %v256_v24 }
  0x6e   : > { %302 = vmatpush1.msra.mxu0 %v255_v25 }
  0x6f   : > { %303 = vmatprep.subr.mxu0 %v254_v26 }
  0x70   : > { %304 = vmatpush1.msra.mxu0 %v253_v27 }
  0x71   : > { %305 = vmatprep.subr.mxu0 %v252_v28 }
  0x72   : > { %306 = vmatpush1.msra.mxu0 %v251_v29 }
  0x73   : > { %307 = vmatprep.subr.mxu0 %v250_v30 }
  0x74   : > { %308 = vmatpush1.msra.mxu0 %v249_v31 }
  0x75   : > { %309 = vmatprep.subr.mxu0 %v248_v32 }
  0x76   : > { %310 = vmatpush1.msra.mxu0 %v247_v33 }
  0x77   : > { %344 = vmatmul.mubr.f32.vlgmr.msra.gmra.mxu0 %v245_v34 }
  0x78   : > { %349 = vmatprep.mubr.f32.mxu0 %v1839_v0 }
  0x7b   : > { %350 = vmatmul.mubr.f32.gmra.mxu0 %v246_v35 }
  0xce   : > { %v365_v46 = vpop.permute.xlu1 %364 }
 0x137   : > { %v345_v36 = vpop.f32.mrf.mxu0 }
 0x138   : > { %v2028_v37 = vmul.f32 0.17677669, %v345_v36 }
 0x139   : > { %v2030_v38 = vpop.f32.mrf.mxu0 }
 0x13a   : > { %1471 = vmatprep.mubr.msk.f32.mxu1 %vm369_vm0, %v2028_v37  ;;  %v2060_v59 = vadd.f32 %v365_v46, %v2030_v38 }
 0x13b   : > { %v351_v39 = vpop.f32.mrf.mxu0 }
 0x13c   : > { %v2044_v41 = vmul.f32 0.17677669, %v351_v39 }
 0x13d   : > { %v2034_v40 = vpop.f32.mrf.mxu0 }
 0x13e   : > { %1467 = vmatprep.subr.msk.mxu1 %vm369_vm0, %v2034_v40  ;;  %v2051_v47 = vadd.f32 %v365_v46, %v2034_v40 }
 0x13f   : > { %1468 = vmatpush3.xpose.msk.msra.mxu1 %vm369_vm0, %v2034_v40 }
 0x140   : > { %1469 = vmatprep.subr.msk.mxu1 %vm369_vm0, %v2030_v38 }
 0x143   : > { %1470 = vmatpush3.xpose.msk.msra.mxu1 %vm369_vm0, %v2030_v38 }
 0x146   : > { %1472 = vmatmul.mubr.msk.f32.vlgmr.msra.gmra.mxu1 %vm369_vm0, %v2044_v41 }
 0x206   : > { %v1473_v42 = vpop.f32.mrf.mxu1 }
 0x207   : > { %v461_v45 = vsel %vm457_vm1, %v1473_v42, -inf }
 0x208   : > { %v448_v43 = vpop.f32.mrf.mxu1 }
 0x209   : > { %v458_v44 = vsel %vm457_vm1, %v448_v43, -inf }
 0x20a   : > { %459 = vmax.xlane.f32.xlu0 %v458_v44 }
 0x20e   : > { %462 = vmax.xlane.f32.xlu0 %v461_v45 }
 0x224   : > { %484 = vrot.lane.b32.xlu0 %v2051_v47, %s1840_s9 }
 0x293   : > { %v460_v48 = vpop.xlane.xlu0 %459 }
 0x294   : > { %v464_v49 = vsub.f32 %v448_v43, %v460_v48 }
 0x296   : > { %v466_v50 = vmul.f32 1.442695, %v464_v49 }
 0x297   : > { %v463_v51 = vpop.xlane.xlu0 %462 }
 0x298   : > { %1650 = vpow2.f32 %v466_v50  ;;  %v465_v52 = vsub.f32 %v1473_v42, %v463_v51 }
 0x29a   : > { %v468_v53 = vmul.f32 1.442695, %v465_v52 }
 0x29b   : > { %v485_v54 = vpop.permute.xlu0 %484 }
 0x29c   : > { %1652 = vpow2.f32 %v468_v53  ;;  %1474 = vmatprep.subr.mxu1 %v485_v54 }
 0x29d   : > { %1475 = vmatpush3.msra.mxu1 %v485_v54 }
 0x2a5   : > { %v1651_v55 = vpop.eup %1650 }
 0x2a6   : > { %v470_v56 = vsel %vm457_vm1, %v1651_v55, 0.0 }
 0x2a7   : > { %471 = vadd.xlane.f32.xlu1 %v470_v56 }
 0x2a9   : > { %v1653_v57 = vpop.eup %1652 }
 0x2aa   : > { %v473_v58 = vsel %vm457_vm1, %v1653_v57, 0.0 }
 0x2ab   : > { %474 = vadd.xlane.f32.xlu0 %v473_v58 }
 0x2b8   : > { %571 = vrot.lane.b32.xlu1 %v2044_v41, %s1841_s10 }
 0x2c1   : > { %482 = vrot.lane.b32.xlu0 %v2060_v59, %s1840_s9 }
 0x2c5   : > { %569 = vrot.lane.b32.xlu0 %v2028_v37, %s1841_s10 }
 0x330   : > { %v472_v60 = vpop.xlane.xlu1 %471 }
 0x331   : > { %1654 = vrcp.f32 %v472_v60 }
 0x334   : > { %v475_v61 = vpop.xlane.xlu0 %474  ;;  %v572_v4 = vpop.permute.xlu1 %571 }
 0x335   : > { %1656 = vrcp.f32 %v475_v61 }
 0x338   : > { %v483_v62 = vpop.permute.xlu0 %482 }
 0x339   : > { %1476 = vmatprep.subr.mxu1 %v483_v62 }
 0x33a   : > { %1477 = vmatpush3.msra.mxu1 %v483_v62 }
 0x33b   : > { %1481 = vmatprep.subr.msk.mxu1 %vm369_vm0, %v2034_v40 }
 0x33c   : > { %v570_v3 = vpop.permute.xlu0 %569 }
 0x33e   : > { %v1655_v63 = vpop.eup %1654 }
 0x33f   : > { %v478_v0 = vmul.f32 %v1655_v63, %v1651_v55 }
 0x341   : > { %1478 = vmatprep.mubr.msk.f32.mxu1 %vm457_vm1, %v478_v0 }
 0x342   : > { %v1657_v1 = vpop.eup %1656 }
 0x343   : > { %v479_v2 = vmul.f32 %v1657_v1, %v1653_v57 }
 0x345   : > { %1479 = vmatmul.mubr.msk.f32.vlgmr.msra.gmra.mxu1 %vm457_vm1, %v479_v2 }
 0x346   : > { %1482 = vmatpush3.xpose.msk.msra.mxu1 %vm369_vm0, %v2034_v40  ;;  %1485 = vmatprep.mubr.msk.f32.mxu1 %vm369_vm0, %v570_v3 }
 0x347   : > { %1483 = vmatprep.subr.msk.mxu1 %vm369_vm0, %v2030_v38 }
 0x34a   : > { %1484 = vmatpush3.xpose.msk.msra.mxu1 %vm369_vm0, %v2030_v38 }
 0x34b   : > { %1488 = vmatprep.subr.mxu1 %v485_v54 }
 0x34d   : > { %1486 = vmatmul.mubr.msk.f32.vlgmr.msra.gmra.mxu1 %vm369_vm0, %v572_v4 }
 0x34e   : > { %1489 = vmatpush3.msra.mxu1 %v485_v54 }
 0x34f   : > { %1490 = vmatprep.subr.mxu1 %v483_v62 }
 0x350   : > { %1491 = vmatpush3.msra.mxu1 %v483_v62 }
 0x405   : > { %v2078_v5 = vpop.f32.mrf.mxu1 }
 0x407   : > { %v2080_v6 = vpop.f32.mrf.mxu1 }
 0x40d   : > { %v1487_v7 = vpop.f32.mrf.mxu1 }
 0x40e   : > { %v655_v8 = vsel %vm457_vm1, %v1487_v7, -inf }
 0x40f   : > { %656 = vmax.xlane.f32.xlu1 %v655_v8  ;;  %v643_v9 = vpop.f32.mrf.mxu1 }
 0x410   : > { %v652_v10 = vsel %vm457_vm1, %v643_v9, -inf }
 0x411   : > { %653 = vmax.xlane.f32.xlu0 %v652_v10 }
 0x420   : > { %759 = vrot.lane.b32.xlu1 %v2030_v38, %s1841_s10 }
 0x498   : > { %v657_v11 = vpop.xlane.xlu1 %656 }
 0x499   : > { %v659_v12 = vsub.f32 %v1487_v7, %v657_v11 }
 0x49a   : > { %v654_v13 = vpop.xlane.xlu0 %653 }
 0x49b   : > { %v662_v14 = vmul.f32 1.442695, %v659_v12  ;;  %v658_v15 = vsub.f32 %v643_v9, %v654_v13 }
 0x49c   : > { %v760_v29 = vpop.permute.xlu1 %759 }
 0x49d   : > { %1658 = vpow2.f32 %v662_v14  ;;  %v660_v16 = vmul.f32 1.442695, %v658_v15 }
 0x49f   : > { %1660 = vpow2.f32 %v660_v16 }
 0x4aa   : > { %v1659_v17 = vpop.eup %1658 }
 0x4ab   : > { %v667_v18 = vsel %vm457_vm1, %v1659_v17, 0.0 }
 0x4ac   : > { %v1661_v19 = vpop.eup %1660  ;;  %668 = vadd.xlane.f32.xlu0 %v667_v18 }
 0x4ad   : > { %v664_v20 = vsel %vm457_vm1, %v1661_v19, 0.0 }
 0x4b0   : > { %665 = vadd.xlane.f32.xlu0 %v664_v20  ;;  %v1187_v20 = vld [vmem:[#allocation7 + $0x70] sm:$0xff] }
 0x4c6   : > { %761 = vrot.lane.b32.xlu0 %v2034_v40, %s1841_s10 }
 0x4ca   : > { %755 = vrot.lane.b32.xlu0 %v2028_v37, %s1840_s9 }
 0x4ce   : > { %757 = vrot.lane.b32.xlu0 %v2044_v41, %s1840_s9 }
 0x535   : > { %v669_v21 = vpop.xlane.xlu0 %668 }
 0x536   : > { %1662 = vrcp.f32 %v669_v21  ;;  %v1186_v21 = vld [vmem:[#allocation7 + $0x68] sm:$0xff] }
 0x539   : > { %v666_v22 = vpop.xlane.xlu0 %665 }
 0x53a   : > { %1664 = vrcp.f32 %v666_v22  ;;  %v1185_v22 = vld [vmem:[#allocation7 + $0x60] sm:$0xff] }
 0x53d   : > { %v762_v23 = vpop.permute.xlu0 %761 }
 0x53e   : > { %1495 = vmatprep.subr.msk.mxu1 %vm369_vm0, %v762_v23 }
 0x541   : > { %v756_v28 = vpop.permute.xlu0 %755 }
 0x543   : > { %v1663_v24 = vpop.eup %1662 }
 0x544   : > { %v673_v27 = vmul.f32 %v1663_v24, %v1659_v17  ;;  %v1183_v24 = vld [vmem:[#allocation7 + $0x50] sm:$0xff] }
 0x545   : > { %v758_v30 = vpop.permute.xlu0 %757 }
 0x547   : > { %v1665_v25 = vpop.eup %1664 }
 0x548   : > { %v672_v26 = vmul.f32 %v1665_v25, %v1661_v19  ;;  %v1188_v19 = vld [vmem:[#allocation7 + $0x78] sm:$0xff]  ;;  %v1182_v25 = vld [vmem:[#allocation7 + $0x48] sm:$0xff] }
 0x549   : > { %1523 = vmatprep.subr.mxu0 %v1188_v19 }
 0x54a   : > { %1492 = vmatprep.mubr.msk.f32.mxu1 %vm457_vm1, %v672_v26  ;;  %1524 = vmatpush3.msra.mxu0 %v1188_v19  ;;  %v1181_v26 = vld [vmem:[#allocation7 + $0x40] sm:$0xff] }
 0x54b   : > { %1493 = vmatmul.mubr.msk.f32.vlgmr.msra.gmra.mxu1 %vm457_vm1, %v673_v27  ;;  %1525 = vmatprep.subr.mxu0 %v1187_v20  ;;  %v1180_v27 = vld [vmem:[#allocation7 + $0x38] sm:$0xff] }
 0x54c   : > { %1496 = vmatpush3.xpose.msk.msra.mxu1 %vm369_vm0, %v762_v23  ;;  %1499 = vmatprep.mubr.msk.f32.mxu1 %vm369_vm0, %v756_v28  ;;  %v1179_v28 = vld [vmem:[#allocation7 + $0x30] sm:$0xff] }
 0x54d   : > { %1497 = vmatprep.subr.msk.mxu1 %vm369_vm0, %v760_v29  ;;  %1526 = vmatpush3.msra.mxu0 %v1187_v20 }
 0x54e   : > { %1527 = vmatprep.subr.mxu0 %v1186_v21 }
 0x54f   : > { %1528 = vmatpush3.msra.mxu0 %v1186_v21 }
 0x550   : > { %1498 = vmatpush3.xpose.msk.msra.mxu1 %vm369_vm0, %v760_v29  ;;  %1529 = vmatprep.subr.mxu0 %v1185_v22 }
 0x551   : > { %1530 = vmatpush3.msra.mxu0 %v1185_v22 }
 0x553   : > { %1500 = vmatmul.mubr.msk.f32.vlgmr.msra.gmra.mxu1 %vm369_vm0, %v758_v30  ;;  %v1177_v30 = vld [vmem:[#allocation7 + $0x20] sm:$0xff] }
 0x60b   : > { %v2102_v31 = vpop.f32.mrf.mxu1 }
 0x60d   : > { %v2104_v32 = vpop.f32.mrf.mxu1 }
 0x60e   : > { %v1635_v33 = vpack.i.bf16 %v2102_v31, %v2104_v32  ;;  %v1176_v31 = vld [vmem:[#allocation7 + $0x18] sm:$0xff]  ;;  %v1175_v32 = vld [vmem:[#allocation7 + $0x10] sm:$0xff] }
 0x613   : > { %v1501_v34 = vpop.f32.mrf.mxu1 }
 0x614   : > { %v849_v35 = vsel %vm457_vm1, %v1501_v34, -inf }
 0x615   : > { %850 = vmax.xlane.f32.xlu0 %v849_v35  ;;  %v837_v36 = vpop.f32.mrf.mxu1 }
 0x616   : > { %v846_v38 = vsel %vm457_vm1, %v837_v36, -inf }
 0x617   : > { %847 = vmax.xlane.f32.xlu1 %v846_v38 }
 0x628   : > { %870 = vrot.lane.b32.xlu1 %v2051_v47, %s1842_s5 }
 0x62c   : > { %955 = vrot.lane.b32.xlu1 %v2028_v37, %s1842_s5 }
 0x630   : > { %957 = vrot.lane.b32.xlu1 %v2044_v41, %s1842_s5 }
 0x69e   : > { %v851_v39 = vpop.xlane.xlu0 %850 }
 0x69f   : > { %v853_v40 = vsub.f32 %v1501_v34, %v851_v39  ;;  %v1173_v34 = vld [vmem:[#allocation7] sm:$0xff] }
 0x6a0   : > { %v848_v42 = vpop.xlane.xlu1 %847 }
 0x6a1   : > { %v856_v43 = vmul.f32 1.442695, %v853_v40  ;;  %v852_v44 = vsub.f32 %v837_v36, %v848_v42 }
 0x6a3   : > { %1666 = vpow2.f32 %v856_v43  ;;  %v854_v45 = vmul.f32 1.442695, %v852_v44 }
 0x6a4   : > { %v871_v46 = vpop.permute.xlu1 %870 }
 0x6a5   : > { %1668 = vpow2.f32 %v854_v45  ;;  %1502 = vmatprep.subr.mxu1 %v871_v46 }
 0x6a6   : > { %1503 = vmatpush3.msra.mxu1 %v871_v46 }
 0x6a8   : > { %v956_v56 = vpop.permute.xlu1 %955 }
 0x6ac   : > { %v958_v57 = vpop.permute.xlu1 %957 }
 0x6b0   : > { %v1667_v48 = vpop.eup %1666 }
 0x6b1   : > { %v861_v47 = vsel %vm457_vm1, %v1667_v48, 0.0 }
 0x6b2   : > { %v1669_v49 = vpop.eup %1668  ;;  %862 = vadd.xlane.f32.xlu0 %v861_v47 }
 0x6b3   : > { %v858_v37 = vsel %vm457_vm1, %v1669_v49, 0.0 }
 0x6b6   : > { %859 = vadd.xlane.f32.xlu0 %v858_v37 }
 0x6cc   : > { %868 = vrot.lane.b32.xlu0 %v2060_v59, %s1842_s5 }
 0x73b   : > { %v863_v41 = vpop.xlane.xlu0 %862 }
 0x73c   : > { %1670 = vrcp.f32 %v863_v41 }
 0x73f   : > { %v860_v50 = vpop.xlane.xlu0 %859 }
 0x740   : > { %1672 = vrcp.f32 %v860_v50 }
 0x743   : > { %v869_v51 = vpop.permute.xlu0 %868 }
 0x744   : > { %1504 = vmatprep.subr.mxu1 %v869_v51 }
 0x745   : > { %1505 = vmatpush3.msra.mxu1 %v869_v51 }
 0x746   : > { %1509 = vmatprep.subr.msk.mxu1 %vm369_vm0, %v762_v23 }
 0x749   : > { %v1671_v52 = vpop.eup %1670 }
 0x74a   : > { %v867_v55 = vmul.f32 %v1671_v52, %v1667_v48 }
 0x74d   : > { %v1673_v53 = vpop.eup %1672 }
 0x74e   : > { %v866_v54 = vmul.f32 %v1673_v53, %v1669_v49 }
 0x750   : > { %1506 = vmatprep.mubr.msk.f32.mxu1 %vm457_vm1, %v866_v54 }
 0x751   : > { %1507 = vmatmul.mubr.msk.f32.vlgmr.msra.gmra.mxu1 %vm457_vm1, %v867_v55 }
 0x752   : > { %1510 = vmatpush3.xpose.msk.msra.mxu1 %vm369_vm0, %v762_v23  ;;  %1513 = vmatprep.mubr.msk.f32.mxu1 %vm369_vm0, %v956_v56  ;;  %v1184_v23 = vld [vmem:[#allocation7 + $0x58] sm:$0xff] }
 0x753   : > { %1511 = vmatprep.subr.msk.mxu1 %vm369_vm0, %v760_v29  ;;  %1531 = vmatprep.subr.mxu0 %v1184_v23 }
 0x754   : > { %1532 = vmatpush3.msra.mxu0 %v1184_v23 }
 0x755   : > { %1533 = vmatprep.subr.mxu0 %v1183_v24 }
 0x756   : > { %1512 = vmatpush3.xpose.msk.msra.mxu1 %vm369_vm0, %v760_v29  ;;  %1534 = vmatpush3.msra.mxu0 %v1183_v24  ;;  %v1178_v29 = vld [vmem:[#allocation7 + $0x28] sm:$0xff] }
 0x757   : > { %1516 = vmatprep.subr.mxu1 %v871_v46  ;;  %1535 = vmatprep.subr.mxu0 %v1182_v25 }
 0x758   : > { %1536 = vmatpush3.msra.mxu0 %v1182_v25 }
 0x759   : > { %1514 = vmatmul.mubr.msk.f32.vlgmr.msra.gmra.mxu1 %vm369_vm0, %v958_v57  ;;  %1537 = vmatprep.subr.mxu0 %v1181_v26 }
 0x75a   : > { %1517 = vmatpush3.msra.mxu1 %v871_v46  ;;  %1538 = vmatpush3.msra.mxu0 %v1181_v26 }
 0x75b   : > { %1518 = vmatprep.subr.mxu1 %v869_v51  ;;  %1539 = vmatprep.subr.mxu0 %v1180_v27 }
 0x75c   : > { %1519 = vmatpush3.msra.mxu1 %v869_v51  ;;  %1540 = vmatpush3.msra.mxu0 %v1180_v27 }
 0x75d   : > { %1541 = vmatprep.subr.mxu0 %v1179_v28 }
 0x75e   : > { %1542 = vmatpush3.msra.mxu0 %v1179_v28 }
 0x75f   : > { %1543 = vmatprep.subr.mxu0 %v1178_v29 }
 0x760   : > { %1544 = vmatpush3.msra.mxu0 %v1178_v29 }
 0x761   : > { %1545 = vmatprep.subr.mxu0 %v1177_v30 }
 0x762   : > { %1546 = vmatpush3.msra.mxu0 %v1177_v30 }
 0x763   : > { %1547 = vmatprep.subr.mxu0 %v1176_v31 }
 0x764   : > { %1548 = vmatpush3.msra.mxu0 %v1176_v31 }
 0x765   : > { %1549 = vmatprep.subr.mxu0 %v1175_v32 }
 0x766   : > { %1550 = vmatpush3.msra.mxu0 %v1175_v32 }
 0x811   : > { %v1508_v58 = vpop.f32.mrf.mxu1 }
 0x813   : > { %v946_v59 = vpop.f32.mrf.mxu1 }
 0x814   : > { %v1640_v60 = vpack.i.bf16 %v1508_v58, %v946_v59 }
 0x819   : > { %v1515_v61 = vpop.f32.mrf.mxu1 }
 0x81a   : > { %v1041_v62 = vsel %vm457_vm1, %v1515_v61, -inf }
 0x81b   : > { %1042 = vmax.xlane.f32.xlu0 %v1041_v62  ;;  %v1029_v63 = vpop.f32.mrf.mxu1 }
 0x81c   : > { %v1038_v0 = vsel %vm457_vm1, %v1029_v63, -inf }
 0x81d   : > { %1039 = vmax.xlane.f32.xlu1 %v1038_v0 }
 0x82e   : > { %1636 = vrot.lane.b32.xlu1 %v1635_v33, %s1842_s5  ;;  %v1174_v33 = vld [vmem:[#allocation7 + $0x8] sm:$0xff] }
 0x82f   : > { %1551 = vmatprep.subr.mxu0 %v1174_v33 }
 0x830   : > { %1552 = vmatpush3.msra.mxu0 %v1174_v33 }
 0x831   : > { %1553 = vmatprep.subr.mxu0 %v1173_v34 }
 0x832   : > { %1554 = vmatpush3.msra.mxu0 %v1173_v34 }
 0x8a4   : > { %v1043_v1 = vpop.xlane.xlu0 %1042 }
 0x8a5   : > { %v1045_v2 = vsub.f32 %v1515_v61, %v1043_v1 }
 0x8a6   : > { %v1040_v3 = vpop.xlane.xlu1 %1039 }
 0x8a7   : > { %v1044_v4 = vsub.f32 %v1029_v63, %v1040_v3  ;;  %v1048_v7 = vmul.f32 1.442695, %v1045_v2 }
 0x8a9   : > { %v1046_v8 = vmul.f32 1.442695, %v1044_v4 }
 0x8aa   : > { %v1637_v39 = vpop.permute.xlu1 %1636 }
 0x8ab   : > { %1674 = vpow2.f32 %v1046_v8  ;;  %v1639_v42 = vunpack.i.h.bf16 %v1637_v39  ;;  %v1638_v43 = vunpack.i.l.bf16 %v1637_v39 }
 0x8ac   : > { %1676 = vpow2.f32 %v1048_v7 }
 0x8ad   : > { %v1166_v48 = vsel %vm369_vm0, %v2078_v5, %v1639_v42  ;;  %v1165_v37 = vsel %vm369_vm0, %v2080_v6, %v1638_v43 }
 0x8b8   : > { %v1675_v9 = vpop.eup %1674 }
 0x8b9   : > { %v1050_v10 = vsel %vm457_vm1, %v1675_v9, 0.0  ;;  %v1677_v11 = vpop.eup %1676 }
 0x8ba   : > { %1051 = vadd.xlane.f32.xlu0 %v1050_v10  ;;  %v1053_v12 = vsel %vm457_vm1, %v1677_v11, 0.0 }
 0x8be   : > { %1054 = vadd.xlane.f32.xlu0 %v1053_v12 }
 0x8d4   : > { %1641 = vrot.lane.b32.xlu0 %v1640_v60, %s1840_s9 }
 0x943   : > { %v1052_v13 = vpop.xlane.xlu0 %1051 }
 0x944   : > { %1678 = vrcp.f32 %v1052_v13 }
 0x947   : > { %v1055_v14 = vpop.xlane.xlu0 %1054 }
 0x948   : > { %1680 = vrcp.f32 %v1055_v14 }
 0x94b   : > { %v1642_v40 = vpop.permute.xlu0 %1641 }
 0x94c   : > { %v1644_v44 = vunpack.i.h.bf16 %v1642_v40  ;;  %v1643_v45 = vunpack.i.l.bf16 %v1642_v40 }
 0x94e   : > { %v1169_v41 = vsel %vm1167_vm2, %v1166_v48, %v1644_v44  ;;  %v1168_v50 = vsel %vm1167_vm2, %v1165_v37, %v1643_v45 }
 0x951   : > { %v1679_v15 = vpop.eup %1678 }
 0x952   : > { %v1058_v16 = vmul.f32 %v1679_v15, %v1675_v9 }
 0x954   : > { %1520 = vmatprep.mubr.msk.f32.mxu1 %vm457_vm1, %v1058_v16 }
 0x955   : > { %v1681_v17 = vpop.eup %1680 }
 0x956   : > { %v1059_v18 = vmul.f32 %v1681_v17, %v1677_v11 }
 0x958   : > { %1521 = vmatmul.mubr.msk.f32.vlgmr.msra.gmra.mxu1 %vm457_vm1, %v1059_v18 }
 0xa18   : > { %v1522_v35 = vpop.f32.mrf.mxu1 }
 0xa1a   : > { %v1132_v36 = vpop.f32.mrf.mxu1 }
 0xa1b   : > { %v1645_v38 = vpack.i.bf16 %v1522_v35, %v1132_v36 }
 0xa1d   : > { %1646 = vrot.lane.b32.xlu1 %v1645_v38, %s1841_s10 }
 0xa8f   : > { %v1647_v46 = vpop.permute.xlu1 %1646 }
 0xa90   : > { %v1649_v47 = vunpack.i.h.bf16 %v1647_v46  ;;  %v1648_v49 = vunpack.i.l.bf16 %v1647_v46 }
 0xa92   : > { %v1171_v51 = vsel %vm1170_vm3, %v1168_v50, %v1648_v49  ;;  %v1172_v52 = vsel %vm1170_vm3, %v1169_v41, %v1649_v47 }
 0xa93   : > { %1555 = vmatprep.mubr.f32.mxu0 %v1171_v51 }
 0xa94   : > { %1556 = vmatmul.mubr.f32.vlgmr.msra.gmra.mxu0 %v1172_v52 }
 0xb54   : > { %v1557_v5 = vpop.f32.mrf.mxu0 }
 0xb55   : > { %1265 = vst [vmem:[%s244_s7 + $0x8] sm:$0xff] %v1557_v5 }
 0xb56   : > { %v1255_v6 = vpop.f32.mrf.mxu0 }
 0xb57   : > { %1264 = vst [vmem:[%s244_s7] sm:$0xff] %v1255_v6 }
 0xb58   : > { %1775 = shalt.err (!%p1772_p9)
}
 0xb59   : > { %s1776_s8 = scalar_lea.hbm %s2149_s30, 256  ;;  %s1780_s9 = scalar_lea.hbm %s2196_s4, 512 }
 0xb5a   : > { %p1777_p13 = scmp.ne.s32.totalorder %s2149_s30, %s1776_s8  ;;  %p1781_p4 = scmp.lt.s32.totalorder %s2149_s30, %s2196_s4 }
 0xb5b   : > { %p1782_p8 = scmp.lt.s32.totalorder %s1780_s9, %s1776_s8 }
 0xb5c   : > { %p1778_p5 = pnand %p1777_p13, %p2212_p10 }
 0xb5d   : > { %p1783_p7 = por %p1782_p8, %p1781_p4 }
 0xb5e   : > { %p1779_p0 = pneg %p1778_p5 }
 0xb60   : > { %p1784_p11 = pnand %p1783_p7, %p1779_p0 }
 0xb62   : > { %1787 = shalt.err (!%p1784_p11)
}
 0xb63   : > { %s1844_s7 = smov 128   ;;  %s1845_s28 = smov 8  }
 0xb64   : > { %1568 = dma.vmem_to_hbm [thread:$0]  (%p2212_p10), %s2144_s11, 256, %s2149_s30, %s1267_s6, %s1844_s7, %s1844_s7, %s1845_s28  }
 0xb65 PF: > { %s1295_s29 = sand.u32 1, %s1818_s15   ;;  %p2213_p1 = scmp.ne.s32.totalorder %s2202_s22, 0 }
 0xb66   : > { %p2214_p2 = scmp.ge.s32.totalorder %s1830_s18, 2  ;;  %s1296_s26 = scalar_lea.sflag [#allocation4], %s1295_s29 }
 0xb68   : > { %p1582_p6 = pnand %p2214_p2, %p2213_p1 }
 0xb6a   : > { %p1583_p12 = pneg %p1582_p6 }
 0xb6c   : > { %1813 = dma.done.wait (%p1583_p12), %s1296_s26, 256  }
 0xb6d   : > { %1815 = vsyncadd (%p1583_p12), %s1296_s26, 4294967040  ;;  %p18_p3 = scmp.ge.s32.totalorder %s1946_s13, 4   ;;  %s2215_s15 = smov %s1822_s16 }
 0xb6e   : > { %s2216_s16 = smov %s1826_s17  ;;  %s2217_s17 = smov %s1955_s24 }
 0xb6f   : > { %s2218_s18 = smov %s1946_s13  ;;  %20 = sbr.rel (!%p18_p3) target bundleno = 6 (0x6), region = 89 }
 0xb74   :  { %1301 = vsyncpa [#allocation3], 1 }
 0xb75   :  { %1303 = vsyncpa [#allocation3 + $0x1], 1 }
 0xb76   :  { %1304 = vsyncpa [#allocation6], 1 }
 0xb77   :  { %1305 = vsyncpa [#allocation4], 1 }
 0xb78   :  { %1307 = vsyncpa [#allocation4 + $0x1], 1 }

</bundles_post_ra>
